<compile_context>
chip_gen: v7x
topology: tpu7x:2x2x1
jax: 0.10.0
libtpu: 0.0.40
codegen_flags: <defaults>
</compile_context>

<pallas_src>
import functools

import jax
import jax.numpy as jnp
from jax.experimental import pallas as pl
from jax.experimental.pallas import tpu as pltpu


def _vmem_capacity_bytes():
    """Physical VMEM of the attached TPU; conservative (v7x) if unknown."""
    try:
        info = pltpu.get_tpu_info()
        cap = getattr(info, "vmem_capacity_bytes", None)
        if cap:
            return int(cap)
    except Exception:
        pass
    return 64 * 1024 * 1024


def _pad_axis_to(x, axis, multiple):
    pad = (-x.shape[axis]) % multiple
    if pad == 0:
        return x
    widths = [(0, 0)] * x.ndim
    widths[axis] = (0, pad)
    return jnp.pad(x, widths)


def _lora_kernel(tm, tn, slice_b, slice_a,
                 w_ref, b_ref, a_ref, scale_ref, o_ref):
    """One (tm, tn) output tile: o = w + (B_rows @ A_cols) * scale."""
    if slice_b:   # lora_B fully VMEM-resident -> slice this tile's rows.
        row = pl.multiple_of(pl.program_id(0) * tm, tm)
        b_blk = b_ref[pl.ds(row, tm), :]
    else:         # already the (tm, rank) block for this tile.
        b_blk = b_ref[...]
    if slice_a:   # lora_A fully VMEM-resident -> slice this tile's columns.
        col = pl.multiple_of(pl.program_id(1) * tn, tn)
        a_blk = a_ref[:, pl.ds(col, tn)]
    else:
        a_blk = a_ref[...]

    delta = jnp.dot(b_blk, a_blk, preferred_element_type=jnp.float32)
    delta = delta * scale_ref[0]
    # Add in the native weight dtype: no full-tile f32 upcast of W.
    o_ref[...] = w_ref[...] + delta.astype(o_ref.dtype)


@functools.partial(
    jax.jit,
    static_argnames=("enabled", "tm", "tn", "w_buffers", "donate_weights"))
def lora_forward(original_weights, lora_B, lora_A, scale, *,
                 enabled=True, tm=None, tn=None, w_buffers=2,
                 donate_weights=False):
    """W + (lora_B @ lora_A).reshape(W.shape) * scale, fused in one pass."""
    if not enabled:
        return original_weights

    features_in, rank = lora_B.shape
    rank_a, features_out = lora_A.shape
    assert rank == rank_a, "lora_B / lora_A rank mismatch"
    assert original_weights.size == features_in * features_out, (
        "original_weights cannot be viewed as (features_in, features_out)")

    w2d = original_weights.reshape(features_in, features_out)
    scale_arr = jnp.asarray(scale, jnp.float32).reshape(1)
    itemsize = w2d.dtype.itemsize

    # ---- generation-aware tile / VMEM budget --------------------------------
    vmem_cap = _vmem_capacity_bytes()
    budget = (vmem_cap * 3) // 4                 # 48 MiB v7x, 96 MiB v5e/v6e
    target_tile = min(4 * 1024 * 1024, budget // 8)
    full_row_cap = budget // 8                   # full-row tile size cap
    resident_cap = budget // 16                  # per-factor residency cap

    if tm is None:
        tm = 256
    tm = min(tm, features_in)
    if tm < features_in:
        tm = max(8, (tm // 8) * 8)               # sublane multiple

    if tn is None:
        if features_out * tm * itemsize <= full_row_cap:
            tn = features_out                    # full rows -> grid 1-D over i
        else:
            tn = max(512, (target_tile // (tm * itemsize)) // 128 * 128)
    tn = min(tn, features_out)
    if tn < features_out:
        tn = max(128, (tn // 128) * 128)         # lane multiple

    # If we took full rows and the tile is still small, grow tm instead.
    if tn == features_out and features_in > tm:
        grow = (target_tile // max(1, tn * itemsize)) // 8 * 8
        tm = min(features_in, max(tm, min(1024, max(8, grow))))

    grid = (pl.cdiv(features_in, tm), pl.cdiv(features_out, tn))

    # ---- keep LoRA factors VMEM-resident (one DMA each) ---------------------
    b_pad = _pad_axis_to(lora_B, 0, tm)          # rows  -> multiple of tm
    a_pad = _pad_axis_to(lora_A, 1, tn)          # cols  -> multiple of tn
    b_bytes = b_pad.size * b_pad.dtype.itemsize
    a_bytes = a_pad.size * a_pad.dtype.itemsize
    b_resident = b_bytes <= resident_cap
    a_resident = a_bytes <= resident_cap

    if b_resident:
        b_spec = pl.BlockSpec(b_pad.shape, lambda i, j: (0, 0))
    else:   # fallback: one small (tm, rank) DMA per row-block (j is inner).
        b_spec = pl.BlockSpec((tm, rank), lambda i, j: (i, 0))
    if a_resident:
        a_spec = pl.BlockSpec(a_pad.shape, lambda i, j: (0, 0))
    else:
        a_spec = pl.BlockSpec((rank, tn), lambda i, j: (0, j))

    slice_b = b_resident and grid[0] > 1
    slice_a = a_resident and grid[1] > 1

    w_spec_kwargs = {}
    if w_buffers != 2:                           # optional deeper W pipeline
        w_spec_kwargs["pipeline_mode"] = pl.Buffered(w_buffers)
    w_spec = pl.BlockSpec((tm, tn), lambda i, j: (i, j), **w_spec_kwargs)

    kernel = functools.partial(_lora_kernel, tm, tn, slice_b, slice_a)

    cost = pl.CostEstimate(
        flops=2 * features_in * rank * features_out
              + features_in * features_out,
        transcendentals=0,
        bytes_accessed=2 * features_in * features_out * itemsize
                       + b_bytes + a_bytes,
    )

    out2d = pl.pallas_call(
        kernel,
        out_shape=jax.ShapeDtypeStruct((features_in, features_out), w2d.dtype),
        grid_spec=pltpu.PrefetchScalarGridSpec(
            num_scalar_prefetch=0,
            grid=grid,
            in_specs=[
                w_spec,                                             # W tile
                b_spec,                                             # lora_B
                a_spec,                                             # lora_A
                pl.BlockSpec(memory_space=pltpu.MemorySpace.SMEM),  # scale
            ],
            out_specs=pl.BlockSpec((tm, tn), lambda i, j: (i, j)),
        ),
        compiler_params=pltpu.CompilerParams(
            dimension_semantics=("parallel", "parallel"),
            vmem_limit_bytes=int(max(32 * 1024 * 1024, budget))),
        cost_estimate=cost,
        # In-place weight patching: caller must also donate the weight buffer
        # at its own jit boundary (jax.jit(..., donate_argnums=0)).
        input_output_aliases=({0: 0} if donate_weights else {}),
    )(w2d, b_pad, a_pad, scale_arr)

    return out2d.reshape(original_weights.shape)


if __name__ == "__main__":
    key = jax.random.PRNGKey(0)
    k_a, k_b, k_w, k_a2, k_b2, k_w2, k_a3, k_b3, k_w3 = jax.random.split(key, 9)

    # --- small config consistent with the module -----------------------------
    features_in, features_out, rank, alpha = 32, 128, 4, 2
    scale = alpha / rank

    # __init__ semantics: lora_A ~ Normal(0, 1), lora_B = zeros.
    lora_A = jax.random.normal(k_a, (rank, features_out), dtype=jnp.float32)
    lora_B = jnp.zeros((features_in, rank), dtype=jnp.float32)
    W = jax.random.normal(k_w, (features_in, features_out), dtype=jnp.float32)

    out = lora_forward(W, lora_B, lora_A, scale, enabled=True)
    jax.block_until_ready(out)
    ref = W + (lora_B @ lora_A).reshape(W.shape) * scale
    assert jnp.allclose(out, ref, atol=1e-4, rtol=1e-4)

    # Non-trivial lora_B (as after training) and a non-2D weight (.view path).
    lora_B_nz = jax.random.normal(k_b, (features_in, rank), dtype=jnp.float32)
    w4d = W.reshape(features_in, 4, 4, 8)             # 4*4*8 == 128
    out_nz = lora_forward(w4d, lora_B_nz, lora_A, scale, enabled=True)
    jax.block_until_ready(out_nz)
    ref_nz = w4d + (lora_B_nz @ lora_A).reshape(w4d.shape) * scale
    assert out_nz.shape == w4d.shape
    assert jnp.allclose(out_nz, ref_nz, atol=1e-4, rtol=1e-4)

    # Disabled path returns weights unchanged.
    out_dis = lora_forward(w4d, lora_B_nz, lora_A, scale, enabled=False)
    assert jnp.array_equal(out_dis, w4d)

    # --- auto-tiled larger shape (full-row / grown-tm path) ------------------
    fi2, fo2 = 512, 2048
    A2 = jax.random.normal(k_a2, (rank, fo2), dtype=jnp.float32)
    B2 = jax.random.normal(k_b2, (fi2, rank), dtype=jnp.float32)
    W2 = jax.random.normal(k_w2, (fi2, fo2), dtype=jnp.float32)
    out2 = lora_forward(W2, B2, A2, scale, enabled=True)
    jax.block_until_ready(out2)
    ref2 = W2 + (B2 @ A2) * scale
    assert jnp.allclose(out2, ref2, atol=1e-4, rtol=1e-4)

    # --- ragged shape with explicit tiles: exercises cdiv tails + resident
    #     B/A in-kernel slicing + zero-padding of the factors. ---------------
    fi3, fo3 = 384, 1536
    A3 = jax.random.normal(k_a3, (rank, fo3), dtype=jnp.float32)
    B3 = jax.random.normal(k_b3, (fi3, rank), dtype=jnp.float32)
    W3 = jax.random.normal(k_w3, (fi3, fo3), dtype=jnp.float32)
    ref3 = W3 + (B3 @ A3) * scale
    out3a = lora_forward(W3, B3, A3, scale, tm=256, tn=512)   # row tail
    jax.block_until_ready(out3a)
    assert jnp.allclose(out3a, ref3, atol=1e-4, rtol=1e-4)
    out3b = lora_forward(W3, B3, A3, scale, tm=256, tn=1024)  # row+col tails
    jax.block_until_ready(out3b)
    assert jnp.allclose(out3b, ref3, atol=1e-4, rtol=1e-4)

    # --- bf16 weights: native-dtype elementwise tail -------------------------
    fi4, fo4, rank4 = 256, 512, 8
    A4 = jax.random.normal(k_a2, (rank4, fo4), dtype=jnp.float32)
    B4 = jax.random.normal(k_b2, (fi4, rank4), dtype=jnp.float32)
    W4 = jax.random.normal(k_w2, (fi4, fo4), dtype=jnp.float32).astype(jnp.bfloat16)
    out4 = lora_forward(W4, B4, A4, scale, enabled=True)
    jax.block_until_ready(out4)
    ref4 = W4 + ((B4 @ A4) * scale).astype(jnp.bfloat16)
    assert out4.dtype == jnp.bfloat16
    assert jnp.allclose(out4.astype(jnp.float32), ref4.astype(jnp.float32),
                        atol=1e-1, rtol=5e-2)

    print("KERNEL_OK")
</pallas_src>

<mosaic_0001>
module attributes {stable_mosaic.version = 11 : i64} {
  func.func @_lora_kernel(%arg0: i32, %arg1: i32, %arg2: memref<32x128xf32, #tpu.memory_space<vmem>>, %arg3: memref<32x4xf32, #tpu.memory_space<vmem>>, %arg4: memref<4x128xf32, #tpu.memory_space<vmem>>, %arg5: memref<1xf32, #tpu.memory_space<smem>>, %arg6: memref<32x128xf32, #tpu.memory_space<vmem>>) attributes {dimension_semantics = [#tpu.dimension_semantics<parallel>, #tpu.dimension_semantics<parallel>], iteration_bounds = array<i64: 1, 1>, scalar_prefetch = 0 : i64, scratch_operands = 0 : i64, tpu.core_type = #tpu.core_type<tc>, window_params = [{transform_indices = @transform_0, window_bounds = array<i64: 32, 128>}, {pipeline_mode = #tpu.pipeline_mode<synchronous>, transform_indices = @transform_1, window_bounds = array<i64: 32, 4>}, {pipeline_mode = #tpu.pipeline_mode<synchronous>, transform_indices = @transform_2, window_bounds = array<i64: 4, 128>}, {transform_indices = @transform_3, window_bounds = array<i64: 1>}, {transform_indices = @transform_4, window_bounds = array<i64: 32, 128>}]} {
    %c0 = arith.constant 0 : index
    %c0_0 = arith.constant 0 : index
    %0 = vector.load %arg3[%c0, %c0_0] : memref<32x4xf32, #tpu.memory_space<vmem>>, vector<32x4xf32>
    %c0_1 = arith.constant 0 : index
    %c0_2 = arith.constant 0 : index
    %1 = vector.load %arg4[%c0_1, %c0_2] : memref<4x128xf32, #tpu.memory_space<vmem>>, vector<4x128xf32>
    %cst = arith.constant dense<0.000000e+00> : vector<32x128xf32>
    %2 = tpu.matmul %0, %1, %cst {dimension_numbers = #tpu.dot_dimension_numbers<[1], [0], [0], [1], [0, 0, 1, 1], [], []>} : vector<32x4xf32>, vector<4x128xf32>, vector<32x128xf32> -> vector<32x128xf32>
    %c0_3 = arith.constant 0 : index
    %3 = memref.load %arg5[%c0_3] : memref<1xf32, #tpu.memory_space<smem>>
    %4 = vector.broadcast %3 : f32 to vector<32x128xf32>
    %5 = arith.mulf %2, %4 : vector<32x128xf32>
    %c0_4 = arith.constant 0 : index
    %c0_5 = arith.constant 0 : index
    %6 = vector.load %arg2[%c0_4, %c0_5] : memref<32x128xf32, #tpu.memory_space<vmem>>, vector<32x128xf32>
    %7 = arith.addf %6, %5 : vector<32x128xf32>
    %c0_6 = arith.constant 0 : index
    %c0_7 = arith.constant 0 : index
    %8 = vector.load %arg6[%c0_6, %c0_7] : memref<32x128xf32, #tpu.memory_space<vmem>>, vector<32x128xf32>
    tpu.vector_store %arg6[%c0_6, %c0_7], %7 {strides = array<i32>} : memref<32x128xf32, #tpu.memory_space<vmem>>, vector<32x128xf32>,
    return
  }
  func.func @transform_0(%arg0: i32, %arg1: i32) -> (i32, i32) {
    %c0_i32 = arith.constant 0 : i32
    return %arg0, %arg1 : i32, i32
  }
  func.func @transform_1(%arg0: i32, %arg1: i32) -> (i32, i32) {
    %c0_i32 = arith.constant 0 : i32
    %c0_i32_0 = arith.constant 0 : i32
    %c0_i32_1 = arith.constant 0 : i32
    return %c0_i32, %c0_i32_0 : i32, i32
  }
  func.func @transform_2(%arg0: i32, %arg1: i32) -> (i32, i32) {
    %c0_i32 = arith.constant 0 : i32
    %c0_i32_0 = arith.constant 0 : i32
    %c0_i32_1 = arith.constant 0 : i32
    return %c0_i32, %c0_i32_0 : i32, i32
  }
  func.func @transform_3(%arg0: i32, %arg1: i32) -> i32 {
    %c0_i32 = arith.constant 0 : i32
    %c0_i32_0 = arith.constant 0 : i32
    return %c0_i32 : i32
  }
  func.func @transform_4(%arg0: i32, %arg1: i32) -> (i32, i32) {
    %c0_i32 = arith.constant 0 : i32
    return %arg0, %arg1 : i32, i32
  }
}

</mosaic_0001>

<bundles_post_ra>
// kernel: lora_forward.1
= control target key start
LH: loop header
LB: loop body
LE: loop exit
PB: predicated region body
PF: predicated region fallthrough
CT: control target
= control target key end

     0   :  { %vm37_vm0 = vcmask 1043456   ;;  %vm24_vm1 = vcmask 31744   ;;  %s277_s0 = inlined_call_operand.vmem [shape: f32[32,128], index: 0, kind: input, shape index: {}]   ;;  %s278_s1 = inlined_call_operand.vmem [shape: f32[32,4], index: 1, kind: input, shape index: {}]   ;;  %s279_s2 = inlined_call_operand.vmem [shape: f32[4,128], index: 2, kind: input, shape index: {}]   ;;  %s280_s3 = inlined_call_operand.<no memory space> [shape: f32[1], index: 3, kind: input, shape index: {}]   ;;  %s281_s4 = inlined_call_operand.hbm [shape: f32[32,128], index: 4, kind: output, shape index: {}]  }
   0x1   :  { %v23_v0 = vld [vmem:[%s279_s2] sm:$0xf]  ;;  %v21_v2 = vld [vmem:[%s278_s1 + $0x10] sm:$0xff]  ;;  %v20_v3 = vld [vmem:[%s278_s1 + $0x8] sm:$0xff] }
   0x2   :  { %v19_v1 = vld [vmem:[%s278_s1] sm:$0xff]  ;;  %170 = vmatprep.subr.msk.mxu0 %vm37_vm0, %v23_v0  ;;  %178 = vmatprep.subr.msk.mxu1 %vm37_vm0, %v23_v0  ;;  %v22_v4 = vld [vmem:[%s278_s1 + $0x18] sm:$0xff] }
   0x3   :  { %10 = vsyncpa [#allocation4], 0  ;;  %171 = vmatpush3.msk.msra.mxu0 %vm37_vm0, %v23_v0  ;;  %179 = vmatpush3.msk.msra.mxu1 %vm37_vm0, %v23_v0  ;;  %v127_v5 = vstv %s280_s3  ;;  %v133_v7 = vld [vmem:[%s277_s0 + $0x8] sm:$0xff]  ;;  %v135_v9 = vld [vmem:[%s277_s0 + $0x18] sm:$0xff]  ;;  %s207_s1 = smov [#allocation3]  }
   0x4   :  { %172 = vmatprep.mubr.msk.f32.mxu0 %vm24_vm1, %v19_v1  ;;  %175 = vmatprep.mubr.msk.f32.mxu1 %vm24_vm1, %v21_v2  ;;  %s149_s30 = sshll.u32 %s207_s1, 4  ;;  %v132_v13 = vld [vmem:[%s277_s0] sm:$0xff]  ;;  %v134_v15 = vld [vmem:[%s277_s0 + $0x10] sm:$0xff]  ;;  %s150_s30 = int_to_ptr.vmem [resolvable:$true] %s149_s30 }
   0x5   :  { %173 = vmatmul.mubr.msk.f32.vlgmr.msra.gmra.mrb[0].mxu0 %vm24_vm1, %v20_v3  ;;  %176 = vmatmul.mubr.msk.f32.vlgmr.msra.gmra.mrb[0].mxu1 %vm24_vm1, %v22_v4  ;;  %s183_s8 = scalar_lea.vmem %s150_s30, 512  ;;  %p188_p1 = scmp.lt.s32.totalorder %s150_s30, %s150_s30 }
   0x6   :  { %p184_p0 = scmp.ne.s32.totalorder %s150_s30, %s183_s8  ;;  %p189_p2 = scmp.lt.s32.totalorder %s183_s8, %s183_s8 }
   0x8   :  { %p190_p3 = por %p189_p2, %p188_p1 }
   0xa   :  { %p191_p4 = pnand %p190_p3, %p184_p0 }
  0xd8   :  { %v174_v6 = vpop.f32.mrb[0].mxu0  ;;  %v177_v8 = vpop.f32.mrb[0].mxu1 }
  0xd9   :  { %v129_v10 = vmul.f32 %v174_v6, %v127_v5  ;;  %v131_v11 = vmul.f32 %v177_v8, %v127_v5  ;;  %v107_v12 = vpop.f32.mrb[1].mxu0  ;;  %v117_v14 = vpop.f32.mrb[1].mxu1 }
  0xda   :  { %v128_v16 = vmul.f32 %v127_v5, %v107_v12  ;;  %v130_v17 = vmul.f32 %v127_v5, %v117_v14 }
  0xdb   :  { %v137_v18 = vadd.f32 %v133_v7, %v129_v10  ;;  %v139_v19 = vadd.f32 %v135_v9, %v131_v11 }
  0xdc   :  { %v136_v20 = vadd.f32 %v132_v13, %v128_v16  ;;  %v138_v21 = vadd.f32 %v134_v15, %v130_v17 }
  0xdd   :  { %141 = vst [vmem:[#allocation3 + $0x8] sm:$0xff] %v137_v18  ;;  %143 = vst [vmem:[#allocation3 + $0x18] sm:$0xff] %v139_v19 }
  0xde   :  { %140 = vst [vmem:[#allocation3] sm:$0xff] %v136_v20  ;;  %142 = vst [vmem:[#allocation3 + $0x10] sm:$0xff] %v138_v21 }
  0xdf   :  { %194 = shalt.err (!%p191_p4)
}
  0xe0   :  { %s195_s10 = scalar_lea.hbm %s281_s4, 512 }
  0xe1   :  { %p196_p5 = scmp.ne.s32.totalorder %s281_s4, %s195_s10  ;;  %p199_p6 = scmp.lt.u32.totalorder %s195_s10, %s281_s4 }
  0xe3   :  { %p201_p7 = pnand %p199_p6, %p196_p5 }
  0xe5   :  { %204 = shalt.err (!%p201_p7)
}
  0xe6   :  { %s208_s15 = smov 128   ;;  %s209_s16 = smov 8  }
  0xe7   :  { %155 = dma.vmem_to_hbm [thread:$0]  %s150_s30, 512, %s281_s4, [#allocation4], %s208_s15, %s208_s15, %s209_s16  }
  0xe8   :  { %205 = dma.done.wait [#allocation4], 512  }
  0xe9   :  { %206 = vsyncadd [#allocation4], 4294966784 }
  0xea   :  { %159 = vsyncpa [#allocation4], 1 }

</bundles_post_ra>
